<compile_context>
chip_gen: v7x
topology: tpu7x:2x2x1
jax: 0.10.0
libtpu: 0.0.40
codegen_flags: <defaults>
</compile_context>

<pallas_src>
import jax
import jax.numpy as jnp
from jax.experimental import pallas as pl
from jax.experimental.pallas import tpu as pltpu


# ----------------------------------------------------------------------------
# Kernel
# ----------------------------------------------------------------------------
def make_resblock_kernel(M, H, NW, downsample):
    """Kernel body factory.

    M  = N*H    : all image rows of the whole batch stacked as the matmul M dim.
    NW = Wout*C : lane-dense output row width (multiple of 128 here).
    """

    def lrelu(v):
        return jnp.where(v > 0, v, 0.01 * v)            # F.leaky_relu default

    def body_common(x, m1_ref, b1_ref, m2_ref, b2_ref):
        # Per-image row index; computed once, reused by both convs.
        row = jax.lax.broadcasted_iota(jnp.int32, (M, NW), 0)
        rh = row % H
        is_top = rh == 0
        is_bot = rh == (H - 1)

        def combine_kh(T):
            # T = [T_kh0 | T_kh1 | T_kh2] of shape (M, 3*NW).  The H-padding
            # of the 3x9 conv means  y[h] = T0[h-1] + T1[h] + T2[h+1]
            # (out of range -> 0).  Row shifts run on the XLU (pltpu.roll);
            # the boundary masks also zero the inter-image seams of the
            # batched (N*H) layout.
            t0 = T[:, 0:NW]
            t1 = T[:, NW:2 * NW]
            t2 = T[:, 2 * NW:3 * NW]
            up = jnp.where(is_top, 0.0, pltpu.roll(t0, shift=1, axis=0))
            dn = jnp.where(is_bot, 0.0, pltpu.roll(t2, shift=M - 1, axis=0))
            return t1 + up + dn

        def conv_bn_act(a, m_ref, b_ref):
            # BN scale is pre-folded into m (wrapper side); fp32 accumulation.
            T = jnp.dot(a, m_ref[...], preferred_element_type=jnp.float32)
            return lrelu(combine_kh(T) + b_ref[...])     # (1, NW) broadcast

        y1 = conv_bn_act(x, m1_ref, b1_ref)
        return conv_bn_act(y1.astype(m2_ref.dtype), m2_ref, b2_ref)

    if downsample:
        def kernel(x_ref, id_ref, m1_ref, b1_ref, m2_ref, b2_ref, m3_ref,
                   out_ref):
            y2 = body_common(x_ref[...], m1_ref, b1_ref, m2_ref, b2_ref)
            # AvgPool2d((1,2),(1,2)) + 1x1 conv folded into a single matmul.
            ident = jnp.dot(id_ref[...], m3_ref[...],
                            preferred_element_type=jnp.float32)
            out_ref[...] = (y2 + ident).astype(out_ref.dtype)
    else:
        def kernel(x_ref, id_ref, m1_ref, b1_ref, m2_ref, b2_ref, out_ref):
            y2 = body_common(x_ref[...], m1_ref, b1_ref, m2_ref, b2_ref)
            out_ref[...] = (y2 + id_ref[...]).astype(out_ref.dtype)

    return kernel


# ----------------------------------------------------------------------------
# Wrapper glue: banded weight matrices, layout, BlockSpecs
# ----------------------------------------------------------------------------
def _band_conv_matrix(w_hwio, w_in, w_out, stride, C):
    """Fold the (kw, ci) reduction and W-padding of a (3,9), pad=(1,4) conv
    into a banded matrix of shape (w_in*C, 3*w_out*C); kh block lives at cols
    [kh*w_out*C : (kh+1)*w_out*C] with
      M[v*C+ci, kh*w_out*C + w*C+co] = w[kh, v - stride*w + 4, ci, co]
    when 0 <= v - stride*w + 4 < 9, else 0."""
    KH, KW, pad = 3, 9, 4
    v = jnp.arange(w_in)
    w = jnp.arange(w_out)
    kw_idx = v[:, None] - stride * w[None, :] + pad              # (w_in, w_out)
    valid = (kw_idx >= 0) & (kw_idx < KW)
    kw_c = jnp.clip(kw_idx, 0, KW - 1)
    blk = w_hwio[:, kw_c, :, :]                                  # (KH,w_in,w_out,C,C)
    blk = blk * valid[None, :, :, None, None].astype(w_hwio.dtype)
    m = jnp.transpose(blk, (1, 3, 0, 2, 4))                      # (v, ci, kh, w, co)
    return m.reshape(w_in * C, KH * w_out * C)


def _pool_1x1_matrix(w3_cc, w_in, w_out, C):
    """AvgPool2d((1,2),(1,2)) followed by a 1x1 conv (bias=False), as one
    matrix: M[v*C+ci, w*C+co] = 0.5 * w3[ci, co] if v in {2w, 2w+1} else 0."""
    v = jnp.arange(w_in)
    w = jnp.arange(w_out)
    d = v[:, None] - 2 * w[None, :]
    sel = ((d == 0) | (d == 1)).astype(w3_cc.dtype) * 0.5        # (w_in, w_out)
    blk = sel[:, :, None, None] * w3_cc[None, None, :, :]        # (v, w, ci, co)
    m = jnp.transpose(blk, (0, 2, 1, 3))                         # (v, ci, w, co)
    return m.reshape(w_in * C, w_out * C)


def resblock_pallas(x_nchw, params, downsample):
    N, C, H, W = x_nchw.shape
    stride = 2 if downsample else 1
    Wout = (W + 2 * 4 - 9) // stride + 1
    NW = Wout * C
    M = N * H
    cdt = jnp.bfloat16

    x = jnp.transpose(x_nchw, (0, 2, 3, 1)).astype(jnp.float32)   # NHWC fp32
    xflat = x.reshape(M, W * C).astype(cdt)                       # bf16 rows

    # Fold BN scale into the conv weights per output channel (HWIO: O is last),
    # build the banded matrices in fp32, cast to bf16 at the call boundary.
    w1s = params['w1'].astype(jnp.float32) * params['s1'].reshape(1, 1, 1, C)
    w2s = params['w2'].astype(jnp.float32) * params['s2'].reshape(1, 1, 1, C)
    m1 = _band_conv_matrix(w1s, W, Wout, stride, C).astype(cdt)
    m2 = _band_conv_matrix(w2s, Wout, Wout, 1, C).astype(cdt)

    def tile_row(p):          # per-channel bias -> lane-dense (1, NW) fp32 row
        return jnp.tile(p.reshape(-1).astype(jnp.float32), Wout).reshape(1, NW)
    b1, b2 = tile_row(params['b1']), tile_row(params['b2'])

    if downsample:
        identity = x
        if H % 2 != 0:   # mirrors the module's `if x.size(2) % 2 != 0` quirk
            identity = jnp.pad(identity, ((0, 0), (0, 0), (1, 0), (0, 0)))
        Wi = identity.shape[2]
        idflat = identity.reshape(M, Wi * C).astype(cdt)
        m3 = _pool_1x1_matrix(params['w3'], Wi, Wi // 2, C).astype(cdt)
        args = (xflat, idflat, m1, b1, m2, b2, m3)
    else:
        # fp32 identity for the residual (avoids bf16 rounding on the skip).
        idflat = x.reshape(M, W * C)
        args = (xflat, idflat, m1, b1, m2, b2)

    def full_spec(a):
        nd = a.ndim
        return pl.BlockSpec(a.shape, lambda i, _nd=nd: (0,) * _nd)

    flops = 2 * M * xflat.shape[1] * m1.shape[1] + 2 * M * NW * m2.shape[1]
    if downsample:
        flops += 2 * M * idflat.shape[1] * m3.shape[1]
    bytes_accessed = sum(int(a.size) * a.dtype.itemsize for a in args) \
        + M * NW * 4

    kernel = make_resblock_kernel(M, H, NW, downsample)

    out_flat = pl.pallas_call(
        kernel,
        out_shape=jax.ShapeDtypeStruct((M, NW), jnp.float32),
        grid_spec=pltpu.PrefetchScalarGridSpec(
            num_scalar_prefetch=0,
            grid=(1,),                       # whole batch in one step
            in_specs=[full_spec(a) for a in args],
            out_specs=pl.BlockSpec((M, NW), lambda i: (0, 0))),
        compiler_params=pltpu.CompilerParams(
            dimension_semantics=("arbitrary",)),
        cost_estimate=pl.CostEstimate(
            flops=int(flops), transcendentals=0,
            bytes_accessed=int(bytes_accessed)),
    )(*args)

    out_nhwc = out_flat.reshape(N, H, Wout, C)
    return jnp.transpose(out_nhwc, (0, 3, 1, 2))                 # back to NCHW


# ----------------------------------------------------------------------------
# Pure-JAX reference (for correctness check)
# ----------------------------------------------------------------------------
def resblock_ref(x_nchw, params, downsample):
    x = jnp.transpose(x_nchw, (0, 2, 3, 1)).astype(jnp.float32)
    H = x.shape[1]
    stride = 2 if downsample else 1
    identity = x
    if H % 2 != 0:
        identity = jnp.pad(identity, ((0, 0), (0, 0), (1, 0), (0, 0)))

    def conv(xx, w, strides, pad):
        return jax.lax.conv_general_dilated(
            xx, w, window_strides=strides, padding=pad,
            dimension_numbers=('NHWC', 'HWIO', 'NHWC'),
            precision=jax.lax.Precision.HIGHEST)

    def lrelu(v):
        return jnp.where(v > 0, v, 0.01 * v)

    y = conv(x, params['w1'], (1, stride), ((1, 1), (4, 4)))
    y = lrelu(y * params['s1'] + params['b1'])
    y = conv(y, params['w2'], (1, 1), ((1, 1), (4, 4)))
    y = lrelu(y * params['s2'] + params['b2'])

    if downsample:
        Wi = identity.shape[2]
        Wp2 = (Wi // 2) * 2
        idp = (identity[:, :, 0:Wp2:2, :] + identity[:, :, 1:Wp2:2, :]) * 0.5
        identity = jnp.einsum('nhwc,cd->nhwd', idp, params['w3'],
                              precision=jax.lax.Precision.HIGHEST)
    return jnp.transpose(y + identity, (0, 3, 1, 2))


# ----------------------------------------------------------------------------
# Main
# ----------------------------------------------------------------------------
if __name__ == "__main__":
    N, C, H, W = 2, 16, 16, 16
    key = jax.random.PRNGKey(0)
    kx, kp = jax.random.split(key, 2)
    x = jax.random.normal(kx, (N, C, H, W), jnp.float32)

    # Deterministic parameter init (shapes from ResBlock.__init__, out_ch=C)
    kk = jax.random.split(kp, 11)
    w1_oihw = jax.random.normal(kk[0], (C, C, 3, 9), jnp.float32) * 0.05
    w2_oihw = jax.random.normal(kk[1], (C, C, 3, 9), jnp.float32) * 0.05
    w3_oihw = jax.random.normal(kk[2], (C, C, 1, 1), jnp.float32) * 0.10
    g1 = 1.0 + 0.1 * jax.random.normal(kk[3], (C,), jnp.float32)
    be1 = 0.1 * jax.random.normal(kk[4], (C,), jnp.float32)
    mu1 = 0.1 * jax.random.normal(kk[5], (C,), jnp.float32)
    v1 = 1.0 + 0.1 * jnp.abs(jax.random.normal(kk[6], (C,), jnp.float32))
    g2 = 1.0 + 0.1 * jax.random.normal(kk[7], (C,), jnp.float32)
    be2 = 0.1 * jax.random.normal(kk[8], (C,), jnp.float32)
    mu2 = 0.1 * jax.random.normal(kk[9], (C,), jnp.float32)
    v2 = 1.0 + 0.1 * jnp.abs(jax.random.normal(kk[10], (C,), jnp.float32))

    eps = 1e-5
    s1 = g1 / jnp.sqrt(v1 + eps)
    s2 = g2 / jnp.sqrt(v2 + eps)
    params = {
        'w1': jnp.transpose(w1_oihw, (2, 3, 1, 0)),   # OIHW -> HWIO
        'w2': jnp.transpose(w2_oihw, (2, 3, 1, 0)),
        'w3': w3_oihw[:, :, 0, 0].T,                  # (Cin, Cout)
        's1': s1.reshape(1, C), 'b1': (be1 - mu1 * s1).reshape(1, C),
        's2': s2.reshape(1, C), 'b2': (be2 - mu2 * s2).reshape(1, C),
    }

    for downsample in (True, False):
        out = jax.block_until_ready(resblock_pallas(x, params, downsample))
        ref = jax.block_until_ready(resblock_ref(x, params, downsample))
        assert out.shape == ref.shape, (out.shape, ref.shape)
        if not bool(jnp.allclose(out, ref, atol=3e-2, rtol=3e-2)):
            raise AssertionError(
                f"downsample={downsample}: max abs err "
                f"{float(jnp.max(jnp.abs(out - ref)))}")

    print("KERNEL_OK")
</pallas_src>

<mosaic_0001>
module attributes {stable_mosaic.version = 11 : i64} {
  func.func @kernel(%arg0: i32, %arg1: memref<32x256xbf16, #tpu.memory_space<vmem>>, %arg2: memref<32x256xbf16, #tpu.memory_space<vmem>>, %arg3: memref<256x384xbf16, #tpu.memory_space<vmem>>, %arg4: memref<1x128xf32, #tpu.memory_space<vmem>>, %arg5: memref<128x384xbf16, #tpu.memory_space<vmem>>, %arg6: memref<1x128xf32, #tpu.memory_space<vmem>>, %arg7: memref<256x128xbf16, #tpu.memory_space<vmem>>, %arg8: memref<32x128xf32, #tpu.memory_space<vmem>>) attributes {dimension_semantics = [#tpu.dimension_semantics<arbitrary>], iteration_bounds = array<i64: 1>, scalar_prefetch = 0 : i64, scratch_operands = 0 : i64, tpu.core_type = #tpu.core_type<tc>, window_params = [{pipeline_mode = #tpu.pipeline_mode<synchronous>, transform_indices = @transform_0, window_bounds = array<i64: 32, 256>}, {pipeline_mode = #tpu.pipeline_mode<synchronous>, transform_indices = @transform_1, window_bounds = array<i64: 32, 256>}, {pipeline_mode = #tpu.pipeline_mode<synchronous>, transform_indices = @transform_2, window_bounds = array<i64: 256, 384>}, {pipeline_mode = #tpu.pipeline_mode<synchronous>, transform_indices = @transform_3, window_bounds = array<i64: 1, 128>}, {pipeline_mode = #tpu.pipeline_mode<synchronous>, transform_indices = @transform_4, window_bounds = array<i64: 128, 384>}, {pipeline_mode = #tpu.pipeline_mode<synchronous>, transform_indices = @transform_5, window_bounds = array<i64: 1, 128>}, {pipeline_mode = #tpu.pipeline_mode<synchronous>, transform_indices = @transform_6, window_bounds = array<i64: 256, 128>}, {pipeline_mode = #tpu.pipeline_mode<synchronous>, transform_indices = @transform_7, window_bounds = array<i64: 32, 128>}]} {
    %c0 = arith.constant 0 : index
    %c0_0 = arith.constant 0 : index
    %0 = vector.load %arg1[%c0, %c0_0] : memref<32x256xbf16, #tpu.memory_space<vmem>>, vector<32x256xbf16>
    %1 = tpu.iota {dimensions = array<i32: 0>} : vector<32x128xi32>
    %c16_i32 = arith.constant 16 : i32
    %c0_i32 = arith.constant 0 : i32
    %2 = arith.cmpi eq, %c16_i32, %c0_i32 : i32
    %c1_i32 = arith.constant 1 : i32
    %3 = arith.select %2, %c1_i32, %c16_i32 : i32
    %4 = vector.broadcast %3 : i32 to vector<32x128xi32>
    %5 = arith.remsi %1, %4 : vector<32x128xi32>
    %c0_i32_1 = arith.constant 0 : i32
    %6 = vector.broadcast %c0_i32_1 : i32 to vector<32x128xi32>
    %7 = arith.cmpi ne, %5, %6 : vector<32x128xi32>
    %c0_i32_2 = arith.constant 0 : i32
    %8 = vector.broadcast %c0_i32_2 : i32 to vector<32x128xi32>
    %9 = arith.cmpi slt, %5, %8 : vector<32x128xi32>
    %c0_i32_3 = arith.constant 0 : i32
    %10 = arith.cmpi slt, %3, %c0_i32_3 : i32
    %11 = vector.broadcast %10 : i1 to vector<32x128xi1>
    %12 = vector.broadcast %11 : vector<32x128xi1> to vector<32x128xi1>
    %13 = arith.xori %9, %12 : vector<32x128xi1>
    %14 = arith.andi %13, %7 : vector<32x128xi1>
    %15 = vector.broadcast %3 : i32 to vector<32x128xi32>
    %16 = arith.addi %5, %15 : vector<32x128xi32>
    %17 = arith.select %14, %16, %5 : vector<32x128xi1>, vector<32x128xi32>
    %c0_i32_4 = arith.constant 0 : i32
    %18 = vector.broadcast %c0_i32_4 : i32 to vector<32x128xi32>
    %19 = arith.cmpi eq, %17, %18 : vector<32x128xi32>
    %c15_i32 = arith.constant 15 : i32
    %20 = vector.broadcast %c15_i32 : i32 to vector<32x128xi32>
    %21 = arith.cmpi eq, %17, %20 : vector<32x128xi32>
    %c0_5 = arith.constant 0 : index
    %c0_6 = arith.constant 0 : index
    %22 = vector.load %arg3[%c0_5, %c0_6] : memref<256x384xbf16, #tpu.memory_space<vmem>>, vector<256x384xbf16>
    %cst = arith.constant dense<0.000000e+00> : vector<32x384xf32>
    %23 = tpu.matmul %0, %22, %cst {dimension_numbers = #tpu.dot_dimension_numbers<[1], [0], [0], [1], [0, 0, 1, 1], [], []>} : vector<32x256xbf16>, vector<256x384xbf16>, vector<32x384xf32> -> vector<32x384xf32>
    %24 = vector.extract_strided_slice %23 {offsets = [0, 0], sizes = [32, 128], strides = [1, 1]} : vector<32x384xf32> to vector<32x128xf32>
    %25 = vector.extract_strided_slice %23 {offsets = [0, 128], sizes = [32, 128], strides = [1, 1]} : vector<32x384xf32> to vector<32x128xf32>
    %26 = vector.extract_strided_slice %23 {offsets = [0, 256], sizes = [32, 128], strides = [1, 1]} : vector<32x384xf32> to vector<32x128xf32>
    %c1_i32_7 = arith.constant 1 : i32
    %27 = tpu.dynamic_rotate %24 by %c1_i32_7 dim 0 : vector<32x128xf32>, i32 -> vector<32x128xf32>
    %cst_8 = arith.constant 0.000000e+00 : f32
    %28 = vector.broadcast %cst_8 : f32 to vector<32x128xf32>
    %29 = arith.select %19, %28, %27 : vector<32x128xi1>, vector<32x128xf32>
    %c31_i32 = arith.constant 31 : i32
    %30 = tpu.dynamic_rotate %26 by %c31_i32 dim 0 : vector<32x128xf32>, i32 -> vector<32x128xf32>
    %cst_9 = arith.constant 0.000000e+00 : f32
    %31 = vector.broadcast %cst_9 : f32 to vector<32x128xf32>
    %32 = arith.select %21, %31, %30 : vector<32x128xi1>, vector<32x128xf32>
    %33 = arith.addf %25, %29 : vector<32x128xf32>
    %34 = arith.addf %33, %32 : vector<32x128xf32>
    %c0_10 = arith.constant 0 : index
    %c0_11 = arith.constant 0 : index
    %35 = vector.load %arg4[%c0_10, %c0_11] : memref<1x128xf32, #tpu.memory_space<vmem>>, vector<1x128xf32>
    %36 = vector.broadcast %35 : vector<1x128xf32> to vector<32x128xf32>
    %37 = arith.addf %34, %36 : vector<32x128xf32>
    %cst_12 = arith.constant 0.000000e+00 : f32
    %38 = vector.broadcast %cst_12 : f32 to vector<32x128xf32>
    %39 = arith.cmpf ogt, %37, %38 : vector<32x128xf32>
    %cst_13 = arith.constant 0.00999999977 : f32
    %40 = vector.broadcast %cst_13 : f32 to vector<32x128xf32>
    %41 = arith.mulf %40, %37 : vector<32x128xf32>
    %42 = arith.select %39, %37, %41 : vector<32x128xi1>, vector<32x128xf32>
    %43 = arith.truncf %42 : vector<32x128xf32> to vector<32x128xbf16>
    %c0_14 = arith.constant 0 : index
    %c0_15 = arith.constant 0 : index
    %44 = vector.load %arg5[%c0_14, %c0_15] : memref<128x384xbf16, #tpu.memory_space<vmem>>, vector<128x384xbf16>
    %cst_16 = arith.constant dense<0.000000e+00> : vector<32x384xf32>
    %45 = tpu.matmul %43, %44, %cst_16 {dimension_numbers = #tpu.dot_dimension_numbers<[1], [0], [0], [1], [0, 0, 1, 1], [], []>} : vector<32x128xbf16>, vector<128x384xbf16>, vector<32x384xf32> -> vector<32x384xf32>
    %46 = vector.extract_strided_slice %45 {offsets = [0, 0], sizes = [32, 128], strides = [1, 1]} : vector<32x384xf32> to vector<32x128xf32>
    %47 = vector.extract_strided_slice %45 {offsets = [0, 128], sizes = [32, 128], strides = [1, 1]} : vector<32x384xf32> to vector<32x128xf32>
    %48 = vector.extract_strided_slice %45 {offsets = [0, 256], sizes = [32, 128], strides = [1, 1]} : vector<32x384xf32> to vector<32x128xf32>
    %c1_i32_17 = arith.constant 1 : i32
    %49 = tpu.dynamic_rotate %46 by %c1_i32_17 dim 0 : vector<32x128xf32>, i32 -> vector<32x128xf32>
    %cst_18 = arith.constant 0.000000e+00 : f32
    %50 = vector.broadcast %cst_18 : f32 to vector<32x128xf32>
    %51 = arith.select %19, %50, %49 : vector<32x128xi1>, vector<32x128xf32>
    %c31_i32_19 = arith.constant 31 : i32
    %52 = tpu.dynamic_rotate %48 by %c31_i32_19 dim 0 : vector<32x128xf32>, i32 -> vector<32x128xf32>
    %cst_20 = arith.constant 0.000000e+00 : f32
    %53 = vector.broadcast %cst_20 : f32 to vector<32x128xf32>
    %54 = arith.select %21, %53, %52 : vector<32x128xi1>, vector<32x128xf32>
    %55 = arith.addf %47, %51 : vector<32x128xf32>
    %56 = arith.addf %55, %54 : vector<32x128xf32>
    %c0_21 = arith.constant 0 : index
    %c0_22 = arith.constant 0 : index
    %57 = vector.load %arg6[%c0_21, %c0_22] : memref<1x128xf32, #tpu.memory_space<vmem>>, vector<1x128xf32>
    %58 = vector.broadcast %57 : vector<1x128xf32> to vector<32x128xf32>
    %59 = arith.addf %56, %58 : vector<32x128xf32>
    %cst_23 = arith.constant 0.000000e+00 : f32
    %60 = vector.broadcast %cst_23 : f32 to vector<32x128xf32>
    %61 = arith.cmpf ogt, %59, %60 : vector<32x128xf32>
    %cst_24 = arith.constant 0.00999999977 : f32
    %62 = vector.broadcast %cst_24 : f32 to vector<32x128xf32>
    %63 = arith.mulf %62, %59 : vector<32x128xf32>
    %64 = arith.select %61, %59, %63 : vector<32x128xi1>, vector<32x128xf32>
    %c0_25 = arith.constant 0 : index
    %c0_26 = arith.constant 0 : index
    %65 = vector.load %arg2[%c0_25, %c0_26] : memref<32x256xbf16, #tpu.memory_space<vmem>>, vector<32x256xbf16>
    %c0_27 = arith.constant 0 : index
    %c0_28 = arith.constant 0 : index
    %66 = vector.load %arg7[%c0_27, %c0_28] : memref<256x128xbf16, #tpu.memory_space<vmem>>, vector<256x128xbf16>
    %cst_29 = arith.constant dense<0.000000e+00> : vector<32x128xf32>
    %67 = tpu.matmul %65, %66, %cst_29 {dimension_numbers = #tpu.dot_dimension_numbers<[1], [0], [0], [1], [0, 0, 1, 1], [], []>} : vector<32x256xbf16>, vector<256x128xbf16>, vector<32x128xf32> -> vector<32x128xf32>
    %68 = arith.addf %64, %67 : vector<32x128xf32>
    %c0_30 = arith.constant 0 : index
    %c0_31 = arith.constant 0 : index
    %69 = vector.load %arg8[%c0_30, %c0_31] : memref<32x128xf32, #tpu.memory_space<vmem>>, vector<32x128xf32>
    tpu.vector_store %arg8[%c0_30, %c0_31], %68 {strides = array<i32>} : memref<32x128xf32, #tpu.memory_space<vmem>>, vector<32x128xf32>,
    return
  }
  func.func @transform_0(%arg0: i32) -> (i32, i32) {
    %c0_i32 = arith.constant 0 : i32
    %c0_i32_0 = arith.constant 0 : i32
    %c0_i32_1 = arith.constant 0 : i32
    return %c0_i32, %c0_i32_0 : i32, i32
  }
  func.func @transform_1(%arg0: i32) -> (i32, i32) {
    %c0_i32 = arith.constant 0 : i32
    %c0_i32_0 = arith.constant 0 : i32
    %c0_i32_1 = arith.constant 0 : i32
    return %c0_i32, %c0_i32_0 : i32, i32
  }
  func.func @transform_2(%arg0: i32) -> (i32, i32) {
    %c0_i32 = arith.constant 0 : i32
    %c0_i32_0 = arith.constant 0 : i32
    %c0_i32_1 = arith.constant 0 : i32
    return %c0_i32, %c0_i32_0 : i32, i32
  }
  func.func @transform_3(%arg0: i32) -> (i32, i32) {
    %c0_i32 = arith.constant 0 : i32
    %c0_i32_0 = arith.constant 0 : i32
    %c0_i32_1 = arith.constant 0 : i32
    return %c0_i32, %c0_i32_0 : i32, i32
  }
  func.func @transform_4(%arg0: i32) -> (i32, i32) {
    %c0_i32 = arith.constant 0 : i32
    %c0_i32_0 = arith.constant 0 : i32
    %c0_i32_1 = arith.constant 0 : i32
    return %c0_i32, %c0_i32_0 : i32, i32
  }
  func.func @transform_5(%arg0: i32) -> (i32, i32) {
    %c0_i32 = arith.constant 0 : i32
    %c0_i32_0 = arith.constant 0 : i32
    %c0_i32_1 = arith.constant 0 : i32
    return %c0_i32, %c0_i32_0 : i32, i32
  }
  func.func @transform_6(%arg0: i32) -> (i32, i32) {
    %c0_i32 = arith.constant 0 : i32
    %c0_i32_0 = arith.constant 0 : i32
    %c0_i32_1 = arith.constant 0 : i32
    return %c0_i32, %c0_i32_0 : i32, i32
  }
  func.func @transform_7(%arg0: i32) -> (i32, i32) {
    %c0_i32 = arith.constant 0 : i32
    %c0_i32_0 = arith.constant 0 : i32
    %c0_i32_1 = arith.constant 0 : i32
    return %c0_i32, %c0_i32_0 : i32, i32
  }
}

</mosaic_0001>

<bundles_post_ra>
// kernel: tpu_custom_call.1
= control target key start
LH: loop header
LB: loop body
LE: loop exit
PB: predicated region body
PF: predicated region fallthrough
CT: control target
= control target key end

     0   :  { %12 = vsyncpa [#allocation3], 0  ;;  %s1888_s0 = inlined_call_operand.hbm [shape: bf16[32,256], index: 0, kind: input, shape index: {}]   ;;  %s1889_s1 = inlined_call_operand.hbm [shape: bf16[32,256], index: 1, kind: input, shape index: {}]   ;;  %s1890_s2 = inlined_call_operand.hbm [shape: bf16[256,384], index: 2, kind: input, shape index: {}]   ;;  %s1891_s3 = inlined_call_operand.vmem [shape: f32[1,128], index: 3, kind: input, shape index: {}]   ;;  %s1892_s4 = inlined_call_operand.hbm [shape: bf16[128,384], index: 4, kind: input, shape index: {}]   ;;  %s1893_s5 = inlined_call_operand.vmem [shape: f32[1,128], index: 5, kind: input, shape index: {}]   ;;  %s1894_s6 = inlined_call_operand.hbm [shape: bf16[256,128], index: 6, kind: input, shape index: {}]   ;;  %s1895_s7 = inlined_call_operand.hbm [shape: f32[32,128], index: 7, kind: output, shape index: {}]  }
   0x1   :  { %13 = vsyncpa [#allocation6], 0 }
   0x2   :  { %14 = vsyncpa [#allocation9], 0 }
   0x3   :  { %15 = vsyncpa [#allocation4], 0  ;;  %s1668_s24 = smov [#allocation5]   ;;  %s1528_s28 = scalar_lea.hbm %s1889_s1, 512 }
   0x4   :  { %s33_s25 = sshll.u32 %s1668_s24, 4  ;;  %p1529_p0 = scmp.ne.s32.totalorder %s1889_s1, %s1528_s28  ;;  %s34_s25 = int_to_ptr.vmem [resolvable:$true] %s33_s25 }
   0x5   :  { %p1532_p1 = scmp.lt.u32.totalorder %s1528_s28, %s1889_s1 }
   0x7   :  { %p1534_p2 = pnand %p1532_p1, %p1529_p0 }
   0x9   :  { %1537 = shalt.err (!%p1534_p2)
}
   0xa   :  { %s1538_s10 = scalar_lea.vmem %s34_s25, 512  ;;  %p1543_p4 = scmp.lt.s32.totalorder %s34_s25, %s34_s25 }
   0xb   :  { %p1539_p3 = scmp.ne.s32.totalorder %s34_s25, %s1538_s10  ;;  %p1544_p5 = scmp.lt.s32.totalorder %s1538_s10, %s1538_s10 }
   0xd   :  { %p1545_p6 = por %p1544_p5, %p1543_p4 }
   0xf   :  { %p1546_p7 = pnand %p1545_p6, %p1539_p3 }
  0x11   :  { %1549 = shalt.err (!%p1546_p7)
}
  0x12   :  { %s1669_s11 = smov 128   ;;  %s1670_s12 = smov 8  }
  0x13   :  { %39 = dma.hbm_to_vmem [thread:$0]  %s1889_s1, 512, %s34_s25, [#allocation6], %s1669_s11, %s1669_s11, %s1670_s12  }
  0x14   :  { %s1671_s15 = smov [#allocation8]   ;;  %s1672_s17 = smov [#allocation2]  }
  0x15   :  { %s59_s16 = sshll.u32 %s1671_s15, 4  ;;  %s21_s18 = sshll.u32 %s1672_s17, 4  ;;  %s60_s16 = int_to_ptr.vmem [resolvable:$true] %s59_s16  ;;  %s22_s18 = int_to_ptr.vmem [resolvable:$true] %s21_s18 }
  0x16   :  { %s1550_s21 = scalar_lea.hbm %s1892_s4, 3072 }
  0x17   :  { %p1551_p8 = scmp.ne.s32.totalorder %s1892_s4, %s1550_s21  ;;  %p1554_p9 = scmp.lt.u32.totalorder %s1550_s21, %s1892_s4 }
  0x19   :  { %p1556_p10 = pnand %p1554_p9, %p1551_p8 }
  0x1b   :  { %1559 = shalt.err (!%p1556_p10)
}
  0x1c   :  { %s1560_s1 = scalar_lea.vmem %s60_s16, 3072  ;;  %p1565_p12 = scmp.lt.s32.totalorder %s60_s16, %s60_s16 }
  0x1d   :  { %p1561_p11 = scmp.ne.s32.totalorder %s60_s16, %s1560_s1  ;;  %p1566_p13 = scmp.lt.s32.totalorder %s1560_s1, %s1560_s1 }
  0x1f   :  { %p1567_p0 = por %p1566_p13, %p1565_p12 }
  0x21   :  { %p1568_p1 = pnand %p1567_p0, %p1561_p11 }
  0x23   :  { %1571 = shalt.err (!%p1568_p1)
}
  0x24   :  { %s1673_s25 = smov 192   ;;  %s1674_s27 = smov 12  }
  0x25   :  { %65 = dma.hbm_to_vmem [thread:$0]  %s1892_s4, 3072, %s60_s16, [#allocation9], %s1673_s25, %s1673_s25, %s1674_s27  }
  0x26   :  { %s1572_s9 = scalar_lea.hbm %s1888_s0, 512 }
  0x27   :  { %p1573_p2 = scmp.ne.s32.totalorder %s1888_s0, %s1572_s9  ;;  %p1576_p3 = scmp.lt.u32.totalorder %s1572_s9, %s1888_s0 }
  0x29   :  { %p1578_p4 = pnand %p1576_p3, %p1573_p2 }
  0x2b   :  { %1581 = shalt.err (!%p1578_p4)
}
  0x2c   :  { %s1582_s17 = scalar_lea.vmem %s22_s18, 512  ;;  %p1587_p6 = scmp.lt.s32.totalorder %s22_s18, %s22_s18 }
  0x2d   :  { %p1583_p5 = scmp.ne.s32.totalorder %s22_s18, %s1582_s17  ;;  %p1588_p7 = scmp.lt.s32.totalorder %s1582_s17, %s1582_s17 }
  0x2f   :  { %p1589_p8 = por %p1588_p7, %p1587_p6 }
  0x31   :  { %p1590_p9 = pnand %p1589_p8, %p1583_p5 }
  0x33   :  { %1593 = shalt.err (!%p1590_p9)
}
  0x34   :  { %27 = dma.hbm_to_vmem [thread:$0]  %s1888_s0, 512, %s22_s18, [#allocation3], %s1669_s11, %s1669_s11, %s1670_s12  }
  0x35   :  { %s1675_s19 = smov [#allocation7]   ;;  %s1676_s21 = smov [#allocation10]  }
  0x36   :  { %s45_s20 = sshll.u32 %s1675_s19, 4  ;;  %s73_s22 = sshll.u32 %s1676_s21, 4  ;;  %s46_s20 = int_to_ptr.vmem [resolvable:$true] %s45_s20  ;;  %s74_s22 = int_to_ptr.vmem [resolvable:$true] %s73_s22 }
  0x37   :  { %s1594_s26 = scalar_lea.hbm %s1890_s2, 6144 }
  0x38   :  { %p1595_p10 = scmp.ne.s32.totalorder %s1890_s2, %s1594_s26  ;;  %p1598_p11 = scmp.lt.u32.totalorder %s1594_s26, %s1890_s2 }
  0x3a   :  { %p1600_p12 = pnand %p1598_p11, %p1595_p10 }
  0x3c   :  { %1603 = shalt.err (!%p1600_p12)
}
  0x3d   :  { %s1604_s0 = scalar_lea.vmem %s46_s20, 6144  ;;  %p1609_p0 = scmp.lt.s32.totalorder %s46_s20, %s46_s20 }
  0x3e   :  { %p1605_p13 = scmp.ne.s32.totalorder %s46_s20, %s1604_s0  ;;  %p1610_p1 = scmp.lt.s32.totalorder %s1604_s0, %s1604_s0 }
  0x40   :  { %p1611_p2 = por %p1610_p1, %p1609_p0 }
  0x42   :  { %p1612_p3 = pnand %p1611_p2, %p1605_p13 }
  0x44   :  { %1615 = shalt.err (!%p1612_p3)
}
  0x45   :  { %51 = dma.hbm_to_vmem [thread:$0]  %s1890_s2, 6144, %s46_s20, [#allocation6], %s1673_s25, %s1673_s25, %s1674_s27  }
  0x46   :  { %s1616_s13 = scalar_lea.hbm %s1894_s6, 2048 }
  0x47   :  { %p1617_p4 = scmp.ne.s32.totalorder %s1894_s6, %s1616_s13  ;;  %p1620_p5 = scmp.lt.u32.totalorder %s1616_s13, %s1894_s6 }
  0x49   :  { %p1622_p6 = pnand %p1620_p5, %p1617_p4 }
  0x4b   :  { %1625 = shalt.err (!%p1622_p6)
}
  0x4c   :  { %s1626_s16 = scalar_lea.vmem %s74_s22, 2048  ;;  %p1631_p8 = scmp.lt.s32.totalorder %s74_s22, %s74_s22 }
  0x4d   :  { %p1627_p7 = scmp.ne.s32.totalorder %s74_s22, %s1626_s16  ;;  %p1632_p9 = scmp.lt.s32.totalorder %s1626_s16, %s1626_s16 }
  0x4f   :  { %p1633_p10 = por %p1632_p9, %p1631_p8 }
  0x51   :  { %p1634_p11 = pnand %p1633_p10, %p1627_p7 }
  0x53   :  { %1637 = shalt.err (!%p1634_p11)
}
  0x54   :  { %s1677_s2 = smov 64   ;;  %s1678_s25 = smov 4  }
  0x55   :  { %79 = dma.hbm_to_vmem [thread:$0]  %s1894_s6, 2048, %s74_s22, [#allocation9], %s1677_s2, %s1677_s2, %s1678_s25  }
  0x56   :  { %1660 = dma.done.wait [#allocation3], 512  }
  0x57   :  { %1661 = vsyncadd [#allocation3], 4294966784 }
  0x58   :  { %1662 = dma.done.wait [#allocation6], 6656  }
  0x59   :  { %1663 = vsyncadd [#allocation6], 4294960640 }
  0x5a   :  { %1664 = dma.done.wait [#allocation9], 5120  }
  0x5b   :  { %1665 = vsyncadd [#allocation9], 4294962176  ;;  %v1404_v0 = vld [vmem:[#allocation7 + $0x4] ss:$12 sps:$4 sm:$0xff]   ;;  %v1406_v1 = vld [vmem:[#allocation7] ss:$12 sps:$4 sm:$0xff]  }
  0x5c   :  { %501 = vmatprep.subr.bf16.mxu0 %v1404_v0  ;;  %v1407_v2 = vld [vmem:[#allocation7 + $0x1c] ss:$12 sps:$4 sm:$0xff]   ;;  %v1409_v3 = vld [vmem:[#allocation7 + $0x18] ss:$12 sps:$4 sm:$0xff]   ;;  %v1410_v4 = vld [vmem:[#allocation7 + $0x34] ss:$12 sps:$4 sm:$0xff]  }
  0x5d   :  { %502 = vmatpush1.bf16.msra.mxu0 %v1406_v1  ;;  %v1412_v5 = vld [vmem:[#allocation7 + $0x30] ss:$12 sps:$4 sm:$0xff]   ;;  %v1413_v6 = vld [vmem:[#allocation7 + $0x4c] ss:$12 sps:$4 sm:$0xff]   ;;  %v1422_v7 = vld [vmem:[#allocation7 + $0xc8] ss:$12 sps:$4 sm:$0xff]  }
  0x5e   :  { %503 = vmatprep.subr.bf16.mxu0 %v1407_v2  ;;  %v1423_v8 = vld [vmem:[#allocation7 + $0x8] ss:$12 sps:$4 sm:$0xff]   ;;  %1305 = vmatprep.subr.bf16.mxu1 %v1422_v7  ;;  %v1416_v10 = vld [vmem:[#allocation7 + $0x64] ss:$12 sps:$4 sm:$0xff]   ;;  %v1427_v11 = vld [vmem:[#allocation7 + $0xe0] ss:$12 sps:$4 sm:$0xff]  }
  0x5f   :  { %v1415_v9 = vld [vmem:[#allocation7 + $0x48] ss:$12 sps:$4 sm:$0xff]   ;;  %1306 = vmatpush3.bf16.msra.mxu1 %v1423_v8  ;;  %v1428_v12 = vld [vmem:[#allocation7 + $0x20] ss:$12 sps:$4 sm:$0xff]   ;;  %v1432_v15 = vld [vmem:[#allocation7 + $0xf8] ss:$12 sps:$4 sm:$0xff]  }
  0x60   :  { %v1418_v13 = vld [vmem:[#allocation7 + $0x60] ss:$12 sps:$4 sm:$0xff]   ;;  %v1419_v14 = vld [vmem:[#allocation7 + $0x7c] ss:$12 sps:$4 sm:$0xff]   ;;  %1307 = vmatprep.subr.bf16.mxu1 %v1427_v11  ;;  %v1433_v16 = vld [vmem:[#allocation7 + $0x38] ss:$12 sps:$4 sm:$0xff]  }
  0x61   :  { %504 = vmatpush1.bf16.msra.mxu0 %v1409_v3  ;;  %v1421_v17 = vld [vmem:[#allocation7 + $0x78] ss:$12 sps:$4 sm:$0xff]   ;;  %v1437_v18 = vld [vmem:[#allocation7 + $0x110] ss:$12 sps:$4 sm:$0xff]   ;;  %v1424_v20 = vld [vmem:[#allocation7 + $0x94] ss:$12 sps:$4 sm:$0xff]  }
  0x62   :  { %505 = vmatprep.subr.bf16.mxu0 %v1410_v4  ;;  %v1438_v19 = vld [vmem:[#allocation7 + $0x50] ss:$12 sps:$4 sm:$0xff]   ;;  %v1442_v22 = vld [vmem:[#allocation7 + $0x128] ss:$12 sps:$4 sm:$0xff]   ;;  %v1429_v24 = vld [vmem:[#allocation7 + $0xac] ss:$12 sps:$4 sm:$0xff]  }
  0x63   :  { %1308 = vmatpush3.bf16.msra.mxu1 %v1428_v12  ;;  %v1426_v21 = vld [vmem:[#allocation7 + $0x90] ss:$12 sps:$4 sm:$0xff]   ;;  %v1443_v23 = vld [vmem:[#allocation7 + $0x68] ss:$12 sps:$4 sm:$0xff]   ;;  %v1447_v25 = vld [vmem:[#allocation7 + $0x140] ss:$12 sps:$4 sm:$0xff]  }
  0x64   :  { %1309 = vmatprep.subr.bf16.mxu1 %v1432_v15  ;;  %v1431_v26 = vld [vmem:[#allocation7 + $0xa8] ss:$12 sps:$4 sm:$0xff]   ;;  %v1434_v27 = vld [vmem:[#allocation7 + $0xc4] ss:$12 sps:$4 sm:$0xff]   ;;  %v1448_v28 = vld [vmem:[#allocation7 + $0x80] ss:$12 sps:$4 sm:$0xff]  }
  0x65   :  { %506 = vmatpush1.bf16.msra.mxu0 %v1412_v5  ;;  %v1452_v29 = vld [vmem:[#allocation7 + $0x158] ss:$12 sps:$4 sm:$0xff]   ;;  %v1436_v30 = vld [vmem:[#allocation7 + $0xc0] ss:$12 sps:$4 sm:$0xff]   ;;  %v1439_v31 = vld [vmem:[#allocation7 + $0xdc] ss:$12 sps:$4 sm:$0xff]  }
  0x66   :  { %507 = vmatprep.subr.bf16.mxu0 %v1413_v6  ;;  %v1453_v32 = vld [vmem:[#allocation7 + $0x98] ss:$12 sps:$4 sm:$0xff]   ;;  %v1457_v33 = vld [vmem:[#allocation7 + $0x170] ss:$12 sps:$4 sm:$0xff]   ;;  %v1444_v37 = vld [vmem:[#allocation7 + $0xf4] ss:$12 sps:$4 sm:$0xff]  }
  0x67   :  { %1310 = vmatpush3.bf16.msra.mxu1 %v1433_v16  ;;  %v1441_v34 = vld [vmem:[#allocation7 + $0xd8] ss:$12 sps:$4 sm:$0xff]   ;;  %v1458_v35 = vld [vmem:[#allocation7 + $0xb0] ss:$12 sps:$4 sm:$0xff]   ;;  %v1462_v39 = vld [vmem:[#allocation2] ss:$8 sps:$4 sm:$0xff]  }
  0x68   :  { %1311 = vmatprep.subr.bf16.mxu1 %v1437_v18  ;;  %v1464_v36 = vld [vmem:[#allocation2 + $0x4] ss:$8 sps:$4 sm:$0xff]   ;;  %v1446_v38 = vld [vmem:[#allocation7 + $0xf0] ss:$12 sps:$4 sm:$0xff]   ;;  %v1451_v43 = vld [vmem:[#allocation7 + $0x108] ss:$12 sps:$4 sm:$0xff]  }
  0x69   :  { %508 = vmatpush1.bf16.msra.mxu0 %v1415_v9  ;;  %586 = vmatprep.mubr.bf16.mxu1 %v1464_v36  ;;  %v1449_v40 = vld [vmem:[#allocation7 + $0x10c] ss:$12 sps:$4 sm:$0xff]   ;;  %v1471_v41 = vld [vmem:[#allocation2 + $0x14] ss:$8 sps:$4 sm:$0xff]   ;;  %v1476_v44 = vld [vmem:[#allocation8 + $0x4] ss:$12 sps:$4 sm:$0xff]  }
  0x6a   :  { %509 = vmatprep.subr.bf16.mxu0 %v1416_v10  ;;  %533 = vmatprep.mubr.bf16.mxu0 %v1464_v36  ;;  %v1474_v42 = vld [vmem:[#allocation8] ss:$12 sps:$4 sm:$0xff]   ;;  %v1454_v45 = vld [vmem:[#allocation7 + $0x124] ss:$12 sps:$4 sm:$0xff]   ;;  %v1459_v48 = vld [vmem:[#allocation7 + $0x13c] ss:$12 sps:$4 sm:$0xff]  }
  0x6b   :  { %1312 = vmatpush3.bf16.msra.mxu1 %v1438_v19  ;;  %v1473_v46 = vld [vmem:[#allocation2 + $0x10] ss:$8 sps:$4 sm:$0xff]   ;;  %v1456_v47 = vld [vmem:[#allocation7 + $0x120] ss:$12 sps:$4 sm:$0xff]   ;;  %v1470_v53 = vld [vmem:[#allocation7 + $0x168] ss:$12 sps:$4 sm:$0xff]  }
  0x6c   :  { %1313 = vmatprep.subr.bf16.mxu1 %v1442_v22  ;;  %v1461_v49 = vld [vmem:[#allocation7 + $0x138] ss:$12 sps:$4 sm:$0xff]   ;;  %v1465_v50 = vld [vmem:[#allocation7 + $0x154] ss:$12 sps:$4 sm:$0xff]   ;;  %v1467_v51 = vld [vmem:[#allocation7 + $0x150] ss:$12 sps:$4 sm:$0xff]  }
  0x6d   :  { %510 = vmatpush1.bf16.msra.mxu0 %v1418_v13  ;;  %v1468_v52 = vld [vmem:[#allocation7 + $0x16c] ss:$12 sps:$4 sm:$0xff]   ;;  %v1477_v54 = vld [vmem:[#allocation8 + $0x8] ss:$12 sps:$4 sm:$0xff]   ;;  %v1482_v59 = vld [vmem:[#allocation8 + $0x30] ss:$12 sps:$4 sm:$0xff]  }
  0x6e   :  { %511 = vmatprep.subr.bf16.mxu0 %v1419_v14  ;;  %v1478_v55 = vld [vmem:[#allocation8 + $0x18] ss:$12 sps:$4 sm:$0xff]   ;;  %v1480_v56 = vld [vmem:[#allocation8 + $0x1c] ss:$12 sps:$4 sm:$0xff]   ;;  %v1481_v57 = vld [vmem:[#allocation8 + $0x20] ss:$12 sps:$4 sm:$0xff]   ;;  %v100_v14 = vlaneseq }
  0x6f   :  { %1314 = vmatpush3.bf16.msra.mxu1 %v1443_v23  ;;  %v1484_v58 = vld [vmem:[#allocation8 + $0x34] ss:$12 sps:$4 sm:$0xff]   ;;  %v1485_v60 = vld [vmem:[#allocation8 + $0x38] ss:$12 sps:$4 sm:$0xff]   ;;  %v1489_v63 = vld [vmem:[#allocation8 + $0x50] ss:$12 sps:$4 sm:$0xff]  }
  0x70   :  { %1315 = vmatprep.subr.bf16.mxu1 %v1447_v25  ;;  %v1488_v61 = vld [vmem:[#allocation8 + $0x4c] ss:$12 sps:$4 sm:$0xff]   ;;  %v1486_v62 = vld [vmem:[#allocation8 + $0x48] ss:$12 sps:$4 sm:$0xff]   ;;  %v1492_v0 = vld [vmem:[#allocation8 + $0x64] ss:$12 sps:$4 sm:$0xff]  }
  0x71   :  { %512 = vmatpush1.bf16.msra.mxu0 %v1421_v17  ;;  %v1490_v1 = vld [vmem:[#allocation8 + $0x60] ss:$12 sps:$4 sm:$0xff]   ;;  %v1493_v2 = vld [vmem:[#allocation8 + $0x68] ss:$12 sps:$4 sm:$0xff]   ;;  %v1494_v4 = vld [vmem:[#allocation8 + $0x78] ss:$12 sps:$4 sm:$0xff]  }
  0x72   :  { %513 = vmatprep.subr.bf16.mxu0 %v1424_v20  ;;  %v1496_v3 = vld [vmem:[#allocation8 + $0x7c] ss:$12 sps:$4 sm:$0xff]   ;;  %v1497_v5 = vld [vmem:[#allocation8 + $0x80] ss:$12 sps:$4 sm:$0xff]   ;;  %v1501_v8 = vld [vmem:[#allocation8 + $0x98] ss:$12 sps:$4 sm:$0xff]  }
  0x73   :  { %1316 = vmatpush3.bf16.msra.mxu1 %v1448_v28  ;;  %v1500_v6 = vld [vmem:[#allocation8 + $0x94] ss:$12 sps:$4 sm:$0xff]   ;;  %v1498_v7 = vld [vmem:[#allocation8 + $0x90] ss:$12 sps:$4 sm:$0xff]   ;;  %v1504_v9 = vld [vmem:[#allocation8 + $0xac] ss:$12 sps:$4 sm:$0xff]  }
  0x74   :  { %1317 = vmatprep.subr.bf16.mxu1 %v1452_v29  ;;  %v1502_v10 = vld [vmem:[#allocation8 + $0xa8] ss:$12 sps:$4 sm:$0xff]   ;;  %v1505_v11 = vld [vmem:[#allocation8 + $0xb0] ss:$12 sps:$4 sm:$0xff]   ;;  %v1506_v12 = vld [vmem:[#allocation10 + $0x40] sm:$0xff]   ;;  %v1679_v13 = vmov 0  }
  0x75   :  { %514 = vmatpush1.bf16.msra.mxu0 %v1426_v21  ;;  %v1794_v19 = vshrl.u32 %v100_v14, 7 }
  0x76   :  { %515 = vmatprep.subr.bf16.mxu0 %v1429_v24 }
  0x77   :  { %1318 = vmatpush3.bf16.msra.mxu1 %v1453_v32  ;;  %vm620_vm0 = vcmp.lt.s32.totalorder %v1794_v19, 7  ;;  %v102_v36 = vadd.s32 8, %v1794_v19  ;;  %vm607_vm2 = vcmp.lt.s32.totalorder %v1794_v19, 1 }
  0x78   :  { %1319 = vmatprep.subr.bf16.mxu1 %v1457_v33 }
  0x79   :  { %516 = vmatpush1.bf16.msra.mxu0 %v1431_v26 }
  0x7a   :  { %517 = vmatprep.subr.bf16.mxu0 %v1434_v27 }
  0x7b   :  { %1320 = vmatpush3.bf16.msra.mxu1 %v1458_v35 }
  0x7c   :  { %822 = vmatprep.subr.bf16.mxu1 %v1476_v44 }
  0x7d   :  { %518 = vmatpush1.bf16.msra.mxu0 %v1436_v30 }
  0x7e   :  { %519 = vmatprep.subr.bf16.mxu0 %v1439_v31  ;;  %587 = vmatmul.mubr.bf16.vlgmr.msra.gmra.mrb[0].mxu1 %v1462_v39 }
  0x7f   :  { %594 = vmatprep.mubr.bf16.mxu1 %v1471_v41  ;;  %823 = vmatpush1.bf16.msra.mxu1 %v1474_v42 }
  0x80   :  { %824 = vmatprep.subr.bf16.mxu1 %v1480_v56  ;;  %v1284_v56 = vld [vmem:[%s1893_s5] ss:$0 sm:$0xff]  ;;  %s1680_s5 = smov [#allocation11]  }
  0x81   :  { %520 = vmatpush1.bf16.msra.mxu0 %v1441_v34  ;;  %s1193_s22 = sshll.u32 %s1680_s5, 4  ;;  %s1194_s22 = int_to_ptr.vmem [resolvable:$true] %s1193_s22 }
  0x82   :  { %521 = vmatprep.subr.bf16.mxu0 %v1444_v37  ;;  %v116_v37 = vand.u32 15, %v102_v36  ;;  %v1514_v36 = vld [vmem:[#allocation10 + $0x60] sm:$0xff]   ;;  %s1638_s23 = scalar_lea.vmem %s1194_s22, 512  ;;  %p1643_p13 = scmp.lt.s32.totalorder %s1194_s22, %s1194_s22 }
  0x83   :  { %825 = vmatpush1.bf16.msra.mxu1 %v1478_v55  ;;  %p1639_p12 = scmp.ne.s32.totalorder %s1194_s22, %s1638_s23  ;;  %p1644_p0 = scmp.lt.s32.totalorder %s1638_s23, %s1638_s23 }
  0x84   :  { %826 = vmatprep.subr.bf16.mxu1 %v1484_v58  ;;  %vm1807_vm1 = vcmp.eq.s32.totalorder %v116_v37, 15  ;;  %v1515_v37 = vld [vmem:[#allocation10 + $0x20] sm:$0xff]  }
  0x85   :  { %522 = vmatpush1.bf16.msra.mxu0 %v1446_v38  ;;  %p1645_p1 = por %p1644_p0, %p1643_p13 }
  0x86   :  { %523 = vmatprep.subr.bf16.mxu0 %v1449_v40  ;;  %595 = vmatmul.mubr.bf16.gmra.mrb[4].mxu1 %v1473_v46  ;;  %v103_v40 = vadd.s32 16, %v1794_v19 }
  0x87   :  { %827 = vmatpush1.bf16.msra.mxu1 %v1482_v59  ;;  %854 = vmatprep.mubr.bf16.mxu1 %v1679_v13  ;;  %p1646_p2 = pnand %p1645_p1, %p1639_p12 }
  0x88   :  { %828 = vmatprep.subr.bf16.mxu1 %v1488_v61 }
  0x89   :  { %524 = vmatpush1.bf16.msra.mxu0 %v1451_v43 }
  0x8a   :  { %525 = vmatprep.subr.bf16.mxu0 %v1454_v45 }
  0x8b   :  { %829 = vmatpush1.bf16.msra.mxu1 %v1486_v62 }
  0x8c   :  { %830 = vmatprep.subr.bf16.mxu1 %v1492_v0 }
  0x8d   :  { %526 = vmatpush1.bf16.msra.mxu0 %v1456_v47 }
  0x8e   :  { %527 = vmatprep.subr.bf16.mxu0 %v1459_v48 }
  0x8f   :  { %831 = vmatpush1.bf16.msra.mxu1 %v1490_v1 }
  0x90   :  { %832 = vmatprep.subr.bf16.mxu1 %v1496_v3 }
  0x91   :  { %528 = vmatpush1.bf16.msra.mxu0 %v1461_v49  ;;  %v123_v49 = vand.u32 15, %v103_v40  ;;  %v1519_v40 = vld [vmem:[#allocation10 + $0x30] sm:$0xff]  }
  0x92   :  { %529 = vmatprep.subr.bf16.mxu0 %v1465_v50 }
  0x93   :  { %833 = vmatpush1.bf16.msra.mxu1 %v1494_v4  ;;  %vm1818_vm3 = vcmp.eq.s32.totalorder %v123_v49, 0 }
  0x94   :  { %834 = vmatprep.subr.bf16.mxu1 %v1500_v6 }
  0x95   :  { %530 = vmatpush1.bf16.msra.mxu0 %v1467_v51  ;;  %v109_v51 = vand.u32 15, %v1794_v19 }
  0x96   :  { %531 = vmatprep.subr.bf16.mxu0 %v1468_v52 }
  0x97   :  { %835 = vmatpush1.bf16.msra.mxu1 %v1498_v7  ;;  %vm1824_vm4 = vcmp.eq.s32.totalorder %v109_v51, 0 }
  0x98   :  { %836 = vmatprep.subr.bf16.mxu1 %v1504_v9 }
  0x99   :  { %532 = vmatpush1.bf16.msra.mxu0 %v1470_v53 }
  0x9a   :  { %1371 = vmatprep.subr.bf16.mxu0 %v1477_v54 }
  0x9b   :  { %837 = vmatpush1.bf16.msra.mxu1 %v1502_v10 }
  0x9c   :  { %534 = vmatmul.mubr.bf16.vlgmr.msra.gmra.mrb[0].mxu0 %v1462_v39  ;;  %1343 = vmatprep.subr.bf16.mxu1 %v1506_v12 }
  0x9d   :  { %543 = vmatprep.mubr.bf16.mxu0 %v1471_v41  ;;  %1372 = vmatpush3.bf16.msra.mxu0 %v1477_v54 }
  0x9e   :  { %1373 = vmatprep.subr.bf16.mxu0 %v1481_v57 }
  0xa1   :  { %1374 = vmatpush3.bf16.msra.mxu0 %v1481_v57 }
  0xa2   :  { %1375 = vmatprep.subr.bf16.mxu0 %v1485_v60 }
  0xa4   :  { %544 = vmatmul.mubr.bf16.gmra.mrb[4].mxu0 %v1473_v46  ;;  %v104_v46 = vadd.s32 24, %v1794_v19 }
  0xa5   :  { %1376 = vmatpush3.bf16.msra.mxu0 %v1485_v60 }
  0xa6   :  { %1377 = vmatprep.subr.bf16.mxu0 %v1489_v63  ;;  %v130_v54 = vand.u32 15, %v104_v46  ;;  %v1527_v46 = vld [vmem:[#allocation5 + $0x10] ss:$8 sps:$4 sm:$0xff]  }
  0xa8   :  { %vm1833_vm5 = vcmp.eq.s32.totalorder %v130_v54, 15 }
  0xa9   :  { %1378 = vmatpush3.bf16.msra.mxu0 %v1489_v63  ;;  %v1259_v63 = vld [vmem:[%s1891_s3] ss:$0 sm:$0xff] }
  0xaa   :  { %1379 = vmatprep.subr.bf16.mxu0 %v1493_v2 }
  0xad   :  { %1380 = vmatpush3.bf16.msra.mxu0 %v1493_v2 }
  0xae   :  { %1381 = vmatprep.subr.bf16.mxu0 %v1497_v5 }
  0xb1   :  { %1382 = vmatpush3.bf16.msra.mxu0 %v1497_v5 }
  0xb2   :  { %1383 = vmatprep.subr.bf16.mxu0 %v1501_v8 }
  0xb5   :  { %1384 = vmatpush3.bf16.msra.mxu0 %v1501_v8 }
  0xb6   :  { %1385 = vmatprep.subr.bf16.mxu0 %v1505_v11 }
  0xb9   :  { %1386 = vmatpush3.bf16.msra.mxu0 %v1505_v11 }
 0x151   :  { %v1321_v15 = vpop.f32.mrb[0].mxu1 }
 0x152   :  { %v1322_v16 = vpop.f32.mrb[1].mxu1 }
 0x153   :  { %v1323_v17 = vadd.f32 %v1322_v16, %v1321_v15  ;;  %v1324_v18 = vpop.f32.mrb[2].mxu1 }
 0x154   :  { %v1325_v20 = vpop.f32.mrb[3].mxu1 }
 0x155   :  { %v616_v21 = vrot.slane %v1323_v17, 1  ;;  %v1326_v22 = vadd.f32 %v1325_v20, %v1324_v18 }
 0x157   :  { %v617_v23 = vrot.slane %v1326_v22, 1 }
 0x159   :  { %v623_v24 = vsel %vm620_vm0, %v616_v21, %v617_v23  ;;  %v1327_v25 = vpop.f32.mrb[4].mxu1 }
 0x15a   :  { %v1328_v26 = vpop.f32.mrb[5].mxu1 }
 0x15b   :  { %v1329_v27 = vadd.f32 %v1328_v26, %v1327_v25  ;;  %v1330_v28 = vpop.f32.mrb[6].mxu1 }
 0x15c   :  { %v1331_v29 = vpop.f32.mrb[7].mxu1 }
 0x15d   :  { %v618_v30 = vrot.slane %v1329_v27, 1  ;;  %v1332_v31 = vadd.f32 %v1331_v29, %v1330_v28  ;;  %v1507_v28 = vld [vmem:[#allocation10] sm:$0xff]  }
 0x15f   :  { %v619_v32 = vrot.slane %v1332_v31, 1  ;;  %v622_v33 = vsel %vm620_vm0, %v617_v23, %v618_v30  ;;  %v1510_v31 = vld [vmem:[#allocation10 + $0x50] sm:$0xff]  }
 0x160   :  { %v626_v48 = vsel %vm1807_vm1, 0.0, %v622_v33  ;;  %v1524_v33 = vld [vmem:[#allocation5 + $0x4] ss:$8 sps:$4 sm:$0xff]  }
 0x161   :  { %v621_v34 = vsel %vm620_vm0, %v618_v30, %v619_v32  ;;  %v624_v35 = vsel %vm620_vm0, %v619_v32, %v616_v21  ;;  %v1508_v30 = vld [vmem:[#allocation10 + $0x48] sm:$0xff]   ;;  %v1511_v32 = vld [vmem:[#allocation10 + $0x10] sm:$0xff]  }
 0x162   :  { %v628_v10 = vsel %vm1833_vm5, 0.0, %v624_v35  ;;  %v1513_v35 = vld [vmem:[#allocation10 + $0x18] sm:$0xff]  }
 0x16f   :  { %v535_v38 = vpop.f32.mrb[0].mxu0 }
 0x170   :  { %v537_v39 = vpop.f32.mrb[1].mxu0  ;;  %v603_v43 = vrot.slane %v535_v38, 7  ;;  %v1516_v38 = vld [vmem:[#allocation10 + $0x68] sm:$0xff]  }
 0x171   :  { %v539_v41 = vpop.f32.mrb[2].mxu0 }
 0x172   :  { %v604_v44 = vrot.slane %v539_v41, 7  ;;  %v541_v45 = vpop.f32.mrb[3].mxu0  ;;  %v1520_v41 = vld [vmem:[#allocation10 + $0x78] sm:$0xff]  }
 0x174   :  { %v610_v47 = vsel %vm607_vm2, %v603_v43, %v604_v44 }
 0x175   :  { %v630_v50 = vadd.f32 %v610_v47, %v541_v45  ;;  %v1525_v45 = vld [vmem:[#allocation5 + $0x14] ss:$8 sps:$4 sm:$0xff]  }
 0x177   :  { %v634_v52 = vadd.f32 %v630_v50, %v626_v48  ;;  %v545_v53 = vpop.f32.mrb[4].mxu0 }
 0x178   :  { %v605_v55 = vrot.slane %v545_v53, 7  ;;  %v547_v57 = vpop.f32.mrb[5].mxu0 }
 0x179   :  { %v549_v58 = vpop.f32.mrb[6].mxu0  ;;  %v645_v7 = vadd.f32 %v1259_v63, %v634_v52 }
 0x17a   :  { %v609_v59 = vsel %vm607_vm2, %v604_v44, %v605_v55  ;;  %v606_v61 = vrot.slane %v549_v58, 7  ;;  %v551_v62 = vpop.f32.mrb[7].mxu0  ;;  %v1522_v44 = vld [vmem:[#allocation5] ss:$8 sps:$4 sm:$0xff]  }
 0x17b   :  { %v614_v0 = vsel %vm1818_vm3, 0.0, %v609_v59  ;;  %v653_v16 = vmul.f32 0.01, %v645_v7  ;;  %vm649_vm7 = vcmp.gt.f32.partialorder %v645_v7, 0.0 }
 0x17c   :  { %v631_v2 = vadd.f32 %v614_v0, %v547_v57  ;;  %v611_v3 = vsel %vm607_vm2, %v606_v61, %v603_v43  ;;  %v608_v4 = vsel %vm607_vm2, %v605_v55, %v606_v61  ;;  %v1521_v43 = vld [vmem:[#allocation10 + $0x38] sm:$0xff]  }
 0x17d   :  { %v612_v5 = vsel %vm1824_vm4, 0.0, %v611_v3  ;;  %v632_v6 = vadd.f32 %v608_v4, %v551_v62  ;;  %v657_v25 = vsel %vm649_vm7, %v645_v7, %v653_v16 }
 0x17e   :  { %v635_v8 = vadd.f32 %v631_v2, %v621_v34  ;;  %v629_v9 = vadd.f32 %v612_v5, %v537_v39  ;;  %v1512_v34 = vld [vmem:[#allocation10 + $0x58] sm:$0xff]   ;;  %v1517_v39 = vld [vmem:[#allocation10 + $0x28] sm:$0xff]  }
 0x17f   :  { %v636_v11 = vadd.f32 %v632_v6, %v628_v10 }
 0x180   :  { %v646_v12 = vadd.f32 %v1259_v63, %v635_v8  ;;  %v633_v14 = vadd.f32 %v629_v9, %v623_v24  ;;  %v1509_v24 = vld [vmem:[#allocation10 + $0x8] sm:$0xff]  }
 0x181   :  { %v647_v15 = vadd.f32 %v1259_v63, %v636_v11 }
 0x182   :  { %vm650_vm6 = vcmp.gt.f32.partialorder %v646_v12, 0.0  ;;  %v654_v17 = vmul.f32 0.01, %v646_v12  ;;  %v644_v18 = vadd.f32 %v1259_v63, %v633_v14 }
 0x183   :  { %vm651_vm8 = vcmp.gt.f32.partialorder %v647_v15, 0.0  ;;  %v655_v20 = vmul.f32 0.01, %v647_v15 }
 0x184   :  { %v658_v21 = vsel %vm650_vm6, %v646_v12, %v654_v17  ;;  %v652_v22 = vmul.f32 0.01, %v644_v18  ;;  %vm648_vm9 = vcmp.gt.f32.partialorder %v644_v18, 0.0 }
 0x185   :  { %v659_v23 = vsel %vm651_vm8, %v647_v15, %v655_v20 }
 0x186   :  { %v661_v26 = vpack.c.bf16 %v659_v23, %v658_v21  ;;  %v656_v27 = vsel %vm648_vm9, %v644_v18, %v652_v22 }
 0x187   :  { %v660_v29 = vpack.c.bf16 %v657_v25, %v656_v27 }
 0x189   :  { %855 = vmatmul.mubr.bf16.vlgmr.msra.gmra.mrb[8].mxu1 %v660_v29  ;;  %1387 = vmatprep.mubr.bf16.mxu0 %v660_v29 }
 0x18a   :  { %1344 = vmatpush3.bf16.msra.mxu1 %v1507_v28  ;;  %1388 = vmatmul.mubr.bf16.vlgmr.msra.gmra.mrb[8].mxu0 %v661_v26 }
 0x18b   :  { %1345 = vmatprep.subr.bf16.mxu1 %v1508_v30  ;;  %864 = vmatprep.mubr.bf16.mxu1 %v1679_v13  ;;  %v1518_v13 = vld [vmem:[#allocation10 + $0x70] sm:$0xff]  }
 0x18e   :  { %1346 = vmatpush3.bf16.msra.mxu1 %v1509_v24 }
 0x18f   :  { %1347 = vmatprep.subr.bf16.mxu1 %v1510_v31 }
 0x191   :  { %865 = vmatmul.mubr.bf16.gmra.mrb[12].mxu1 %v661_v26 }
 0x192   :  { %1348 = vmatpush3.bf16.msra.mxu1 %v1511_v32  ;;  %1163 = vmatprep.mubr.bf16.mxu1 %v1524_v33 }
 0x193   :  { %1349 = vmatprep.subr.bf16.mxu1 %v1512_v34 }
 0x196   :  { %1350 = vmatpush3.bf16.msra.mxu1 %v1513_v35 }
 0x197   :  { %1351 = vmatprep.subr.bf16.mxu1 %v1514_v36 }
 0x19a   :  { %1352 = vmatpush3.bf16.msra.mxu1 %v1515_v37 }
 0x19b   :  { %1353 = vmatprep.subr.bf16.mxu1 %v1516_v38 }
 0x19e   :  { %1354 = vmatpush3.bf16.msra.mxu1 %v1517_v39 }
 0x19f   :  { %1355 = vmatprep.subr.bf16.mxu1 %v1518_v13 }
 0x1a2   :  { %1356 = vmatpush3.bf16.msra.mxu1 %v1519_v40 }
 0x1a3   :  { %1357 = vmatprep.subr.bf16.mxu1 %v1520_v41 }
 0x1a6   :  { %1358 = vmatpush3.bf16.msra.mxu1 %v1521_v43 }
 0x1a9   :  { %1164 = vmatmul.mubr.bf16.vlgmr.msra.gmra.mrb[16].mxu1 %v1522_v44 }
 0x1aa   :  { %1171 = vmatprep.mubr.bf16.mxu1 %v1525_v45 }
 0x1b1   :  { %1172 = vmatmul.mubr.bf16.gmra.mrb[20].mxu1 %v1527_v46 }
 0x25c   :  { %v856_v47 = vpop.f32.mrb[8].mxu1 }
 0x25d   :  { %v858_v48 = vpop.f32.mrb[9].mxu1  ;;  %v1389_v49 = vpop.f32.mrb[8].mxu0  ;;  %v924_v52 = vrot.slane %v856_v47, 7 }
 0x25e   :  { %v860_v50 = vpop.f32.mrb[10].mxu1  ;;  %v909_v51 = vpop.f32.mrb[9].mxu0  ;;  %v938_v58 = vrot.slane %v1389_v49, 1 }
 0x25f   :  { %v925_v53 = vrot.slane %v860_v50, 7  ;;  %v936_v54 = vrot.slane %v909_v51, 1  ;;  %v862_v55 = vpop.f32.mrb[11].mxu1  ;;  %v1390_v57 = vpop.f32.mrb[10].mxu0 }
 0x260   :  { %v939_v59 = vrot.slane %v1390_v57, 1  ;;  %v912_v61 = vpop.f32.mrb[11].mxu0 }
 0x261   :  { %v930_v62 = vsel %vm607_vm2, %v924_v52, %v925_v53  ;;  %v937_v63 = vrot.slane %v912_v61, 1 }
 0x262   :  { %v949_v0 = vadd.f32 %v930_v62, %v862_v55  ;;  %v940_v2 = vsel %vm620_vm0, %v938_v58, %v939_v59  ;;  %v943_v3 = vsel %vm620_vm0, %v939_v59, %v936_v54 }
 0x263   :  { %v941_v4 = vsel %vm620_vm0, %v937_v63, %v938_v58  ;;  %v942_v5 = vsel %vm620_vm0, %v936_v54, %v937_v63  ;;  %v947_v25 = vsel %vm1833_vm5, 0.0, %v943_v3 }
 0x264   :  { %v945_v6 = vsel %vm1807_vm1, 0.0, %v941_v4  ;;  %v866_v7 = vpop.f32.mrb[12].mxu1 }
 0x265   :  { %v953_v8 = vadd.f32 %v949_v0, %v945_v6  ;;  %v926_v9 = vrot.slane %v866_v7, 7  ;;  %v868_v10 = vpop.f32.mrb[13].mxu1 }
 0x266   :  { %v870_v11 = vpop.f32.mrb[14].mxu1 }
 0x267   :  { %v929_v12 = vsel %vm607_vm2, %v925_v53, %v926_v9  ;;  %v927_v14 = vrot.slane %v870_v11, 7  ;;  %v872_v15 = vpop.f32.mrb[15].mxu1  ;;  %v964_v29 = vadd.f32 %v1284_v56, %v953_v8 }
 0x268   :  { %v934_v16 = vsel %vm1818_vm3, 0.0, %v929_v12 }
 0x269   :  { %v950_v17 = vadd.f32 %v934_v16, %v868_v10  ;;  %v931_v18 = vsel %vm607_vm2, %v927_v14, %v924_v52  ;;  %v928_v42 = vsel %vm607_vm2, %v926_v9, %v927_v14  ;;  %v972_v60 = vmul.f32 0.01, %v964_v29 }
 0x26a   :  { %v932_v20 = vsel %vm1824_vm4, 0.0, %v931_v18  ;;  %v951_v21 = vadd.f32 %v928_v42, %v872_v15  ;;  %vm968_vm11 = vcmp.gt.f32.partialorder %v964_v29, 0.0 }
 0x26b   :  { %v954_v22 = vadd.f32 %v950_v17, %v940_v2  ;;  %v948_v23 = vadd.f32 %v932_v20, %v858_v48  ;;  %v976_v38 = vsel %vm968_vm11, %v964_v29, %v972_v60 }
 0x26c   :  { %v955_v26 = vadd.f32 %v951_v21, %v947_v25 }
 0x26d   :  { %v952_v27 = vadd.f32 %v948_v23, %v942_v5  ;;  %v965_v33 = vadd.f32 %v1284_v56, %v954_v22 }
 0x26e   :  { %v966_v37 = vadd.f32 %v1284_v56, %v955_v26 }
 0x26f   :  { %v963_v28 = vadd.f32 %v1284_v56, %v952_v27  ;;  %v973_v13 = vmul.f32 0.01, %v965_v33  ;;  %vm969_vm12 = vcmp.gt.f32.partialorder %v965_v33, 0.0 }
 0x270   :  { %v974_v43 = vmul.f32 0.01, %v966_v37  ;;  %vm970_vm13 = vcmp.gt.f32.partialorder %v966_v37, 0.0 }
 0x271   :  { %v971_v30 = vmul.f32 0.01, %v963_v28  ;;  %vm967_vm10 = vcmp.gt.f32.partialorder %v963_v28, 0.0  ;;  %v977_v46 = vsel %vm969_vm12, %v965_v33, %v973_v13 }
 0x272   :  { %v978_v50 = vsel %vm970_vm13, %v966_v37, %v974_v43 }
 0x273   :  { %v975_v34 = vsel %vm967_vm10, %v963_v28, %v971_v30 }
 0x27c   :  { %v1359_v19 = vpop.f32.mrb[16].mxu1 }
 0x27d   :  { %v1360_v24 = vpop.f32.mrb[17].mxu1 }
 0x27e   :  { %v1361_v31 = vadd.f32 %v1360_v24, %v1359_v19  ;;  %v1362_v32 = vpop.f32.mrb[18].mxu1 }
 0x27f   :  { %v1363_v1 = vpop.f32.mrb[19].mxu1 }
 0x280   :  { %v1180_v35 = vadd.f32 %v1361_v31, %v975_v34  ;;  %v1364_v36 = vadd.f32 %v1363_v1, %v1362_v32 }
 0x282   :  { %1184 = vst [vmem:[#allocation11] sm:$0xff] %v1180_v35  ;;  %v1181_v39 = vadd.f32 %v1364_v36, %v976_v38 }
 0x284   :  { %1185 = vst [vmem:[#allocation11 + $0x8] sm:$0xff] %v1181_v39  ;;  %v1365_v40 = vpop.f32.mrb[20].mxu1 }
 0x285   :  { %v1366_v41 = vpop.f32.mrb[21].mxu1 }
 0x286   :  { %v1367_v44 = vadd.f32 %v1366_v41, %v1365_v40  ;;  %v1368_v45 = vpop.f32.mrb[22].mxu1 }
 0x287   :  { %v1369_v47 = vpop.f32.mrb[23].mxu1 }
 0x288   :  { %v1182_v48 = vadd.f32 %v1367_v44, %v977_v46  ;;  %v1370_v49 = vadd.f32 %v1369_v47, %v1368_v45 }
 0x28a   :  { %1186 = vst [vmem:[#allocation11 + $0x10] sm:$0xff] %v1182_v48  ;;  %v1183_v51 = vadd.f32 %v1370_v49, %v978_v50 }
 0x28c   :  { %1187 = vst [vmem:[#allocation11 + $0x18] sm:$0xff] %v1183_v51 }
 0x28d   :  { %1649 = shalt.err (!%p1646_p2)
}
 0x28e   :  { %s1650_s1 = scalar_lea.hbm %s1895_s7, 512 }
 0x28f   :  { %p1651_p3 = scmp.ne.s32.totalorder %s1895_s7, %s1650_s1  ;;  %p1654_p4 = scmp.lt.u32.totalorder %s1650_s1, %s1895_s7 }
 0x291   :  { %p1656_p5 = pnand %p1654_p4, %p1651_p3 }
 0x293   :  { %1659 = shalt.err (!%p1656_p5)
}
 0x294   :  { %1199 = dma.vmem_to_hbm [thread:$0]  %s1194_s22, 512, %s1895_s7, [#allocation4], %s1669_s11, %s1669_s11, %s1670_s12  }
 0x295   :  { %1666 = dma.done.wait [#allocation4], 512  }
 0x296   :  { %1667 = vsyncadd [#allocation4], 4294966784 }
 0x297   :  { %1203 = vsyncpa [#allocation3], 1 }
 0x298   :  { %1204 = vsyncpa [#allocation6], 1 }
 0x299   :  { %1205 = vsyncpa [#allocation9], 1 }
 0x29a   :  { %1206 = vsyncpa [#allocation4], 1 }

</bundles_post_ra>
